<compile_context>
chip_gen: v7x
topology: tpu7x:2x2x1
jax: 0.10.0
libtpu: 0.0.40
codegen_flags: <defaults>
</compile_context>

<pallas_src>
import jax
import jax.numpy as jnp
from jax.experimental import pallas as pl
from jax.experimental.pallas import tpu as pltpu

BN_EPS = 1e-5  # PyTorch BatchNorm1d default eps


def dino_head_kernel(x_ref, w1_ref, gamma_ref, beta_ref, w2_ref, b2_ref,
                     o_ref, h_ref):
    j = pl.program_id(0)

    # Compute the hidden activation once (first grid step); reuse for all tiles.
    @pl.when(j == 0)
    def _():
        # Linear 1 (no bias): bf16 operands, f32 accumulation on the MXU.
        h = jnp.dot(x_ref[...], w1_ref[...], preferred_element_type=jnp.float32)
        n = h.shape[0]
        inv_n = 1.0 / n

        # BatchNorm1d, training-mode batch stats, single pass over h:
        #   mean = E[h], var = E[h^2] - mean^2  (biased variance, like PyTorch).
        mean = jnp.sum(h, axis=0, keepdims=True) * inv_n            # (1, H)
        mean_sq = jnp.sum(h * h, axis=0, keepdims=True) * inv_n     # (1, H)
        var = mean_sq - mean * mean
        inv_std = jax.lax.rsqrt(var + BN_EPS)

        # Fold affine params: y = h * scale + shift  (one FMA pass over h).
        scale = gamma_ref[...] * inv_std                            # (1, H)
        shift = beta_ref[...] - mean * scale                        # (1, H)
        hn = h * scale + shift

        # ReLU, then stash as bf16 for the second MXU matmul.
        hn = jnp.maximum(hn, 0.0)
        h_ref[...] = hn.astype(h_ref.dtype)

    # Linear 2, one lane-dense output tile per grid step:
    #   (N, hidden) @ (hidden, TILE_OUT) + b2[tile]
    out = jnp.dot(h_ref[...], w2_ref[...], preferred_element_type=jnp.float32)
    o_ref[...] = (out + b2_ref[...]).astype(o_ref.dtype)


def dino_head_forward(x, w1_t, gamma, beta, w2_t, b2, *, tile_out=None):
    """x: (N, in_dim); w1_t: (in_dim, 256); w2_t: (256, out_dim); b2: (out_dim,)."""
    n, in_dim = x.shape
    hidden = w1_t.shape[1]
    out_dim = w2_t.shape[1]

    if tile_out is None:
        tile_out = min(512, out_dim)
    assert tile_out % 128 == 0, "keep output tiles lane-dense (multiple of 128)"
    assert out_dim % tile_out == 0, "out_dim must be a multiple of tile_out"
    num_tiles = out_dim // tile_out

    # bf16 operands for both matmuls (halves HBM/VMEM bytes, MXU-native);
    # BN affine params and bias stay f32.
    x_bf = x.astype(jnp.bfloat16)
    w1_bf = w1_t.astype(jnp.bfloat16)
    w2_bf = w2_t.astype(jnp.bfloat16)
    gamma2 = gamma.reshape(1, hidden).astype(jnp.float32)
    beta2 = beta.reshape(1, hidden).astype(jnp.float32)
    b2_2 = b2.reshape(1, out_dim).astype(jnp.float32)

    flops = 2 * n * in_dim * hidden + 2 * n * hidden * out_dim + 8 * n * hidden
    bytes_accessed = (
        2 * (n * in_dim + in_dim * hidden + hidden * out_dim)   # bf16 inputs
        + 4 * (2 * hidden + out_dim + n * out_dim)              # f32 params + out
    )

    return pl.pallas_call(
        dino_head_kernel,
        out_shape=jax.ShapeDtypeStruct((n, out_dim), jnp.float32),
        grid_spec=pltpu.PrefetchScalarGridSpec(
            num_scalar_prefetch=0,
            grid=(num_tiles,),
            in_specs=[
                pl.BlockSpec((n, in_dim), lambda j: (0, 0)),       # x (resident)
                pl.BlockSpec((in_dim, hidden), lambda j: (0, 0)),  # w1 (resident)
                pl.BlockSpec((1, hidden), lambda j: (0, 0)),       # gamma
                pl.BlockSpec((1, hidden), lambda j: (0, 0)),       # beta
                pl.BlockSpec((hidden, tile_out), lambda j: (0, j)),  # w2 (streamed)
                pl.BlockSpec((1, tile_out), lambda j: (0, j)),       # b2 (streamed)
            ],
            out_specs=pl.BlockSpec((n, tile_out), lambda j: (0, j)),
            scratch_shapes=[pltpu.VMEM((n, hidden), jnp.bfloat16)],  # h activation
        ),
        compiler_params=pltpu.CompilerParams(
            # Sequential walk of the out_dim axis is required for correctness:
            # the h scratch is initialized only at j == 0.
            dimension_semantics=("arbitrary",),
            # Stay well under v7x's 64 MiB physical VMEM per TensorCore.
            vmem_limit_bytes=48 << 20,
        ),
        cost_estimate=pl.CostEstimate(
            flops=flops, transcendentals=0, bytes_accessed=bytes_accessed),
    )(x_bf, w1_bf, gamma2, beta2, w2_bf, b2_2)


def reference_forward(x, w1_t, gamma, beta, w2_t, b2):
    """Pure f32 reference matching PyTorch DINOHead forward (train-mode BN)."""
    h = x @ w1_t
    mean = h.mean(axis=0, keepdims=True)
    var = ((h - mean) ** 2).mean(axis=0, keepdims=True)
    h = (h - mean) / jnp.sqrt(var + BN_EPS)
    h = h * gamma[None, :] + beta[None, :]
    h = jnp.maximum(h, 0.0)
    return h @ w2_t + b2[None, :]


def _run_case(n, in_dim, hidden, out_dim, tile_out, key):
    kx, kw1, kw2, kb2, kg, kb = jax.random.split(key, 6)
    x = jax.random.normal(kx, (n, in_dim), dtype=jnp.float32)
    # PyTorch Linear weight is (out, in); we store the transposed (in, out) layout.
    w1_t = jax.random.normal(kw1, (in_dim, hidden), dtype=jnp.float32) * 0.05
    w2_t = jax.random.normal(kw2, (hidden, out_dim), dtype=jnp.float32) * 0.05
    b2 = jax.random.normal(kb2, (out_dim,), dtype=jnp.float32) * 0.01
    gamma = jnp.ones((hidden,), jnp.float32) + 0.01 * jax.random.normal(kg, (hidden,))
    beta = 0.01 * jax.random.normal(kb, (hidden,), dtype=jnp.float32)

    out = dino_head_forward(x, w1_t, gamma, beta, w2_t, b2, tile_out=tile_out)
    out = jax.block_until_ready(out)
    ref = reference_forward(x, w1_t, gamma, beta, w2_t, b2)

    assert out.shape == (n, out_dim)
    # Loose tolerance: matmul operands are bf16 (f32 accumulation); the f32
    # reference differs at the ~1e-2 level but any semantic bug would be O(1).
    assert jnp.allclose(out, ref, atol=8e-2, rtol=8e-2), (
        f"mismatch vs reference: max abs err {jnp.max(jnp.abs(out - ref))}")


if __name__ == "__main__":
    key = jax.random.PRNGKey(0)
    k1, k2 = jax.random.split(key)

    # Default DINOHead shapes (in_dim=512, hidden=256, out_dim=128), small batch.
    _run_case(n=32, in_dim=512, hidden=256, out_dim=128, tile_out=128, key=k1)
    # Multi-tile grid: out_dim streamed in 256-wide lane-dense slabs (grid=(4,)).
    _run_case(n=32, in_dim=512, hidden=256, out_dim=1024, tile_out=256, key=k2)

    print("KERNEL_OK")
</pallas_src>

<mosaic_0001>
module attributes {stable_mosaic.version = 11 : i64} {
  func.func @dino_head_kernel(%arg0: i32, %arg1: memref<32x512xbf16, #tpu.memory_space<vmem>>, %arg2: memref<512x256xbf16, #tpu.memory_space<vmem>>, %arg3: memref<1x256xf32, #tpu.memory_space<vmem>>, %arg4: memref<1x256xf32, #tpu.memory_space<vmem>>, %arg5: memref<256x128xbf16, #tpu.memory_space<vmem>>, %arg6: memref<1x128xf32, #tpu.memory_space<vmem>>, %arg7: memref<32x128xf32, #tpu.memory_space<vmem>>, %arg8: memref<32x256xbf16, #tpu.memory_space<vmem>>) attributes {dimension_semantics = [#tpu.dimension_semantics<arbitrary>], iteration_bounds = array<i64: 1>, scalar_prefetch = 0 : i64, scratch_operands = 1 : i64, tpu.core_type = #tpu.core_type<tc>, window_params = [{pipeline_mode = #tpu.pipeline_mode<synchronous>, transform_indices = @transform_0, window_bounds = array<i64: 32, 512>}, {pipeline_mode = #tpu.pipeline_mode<synchronous>, transform_indices = @transform_1, window_bounds = array<i64: 512, 256>}, {pipeline_mode = #tpu.pipeline_mode<synchronous>, transform_indices = @transform_2, window_bounds = array<i64: 1, 256>}, {pipeline_mode = #tpu.pipeline_mode<synchronous>, transform_indices = @transform_3, window_bounds = array<i64: 1, 256>}, {transform_indices = @transform_4, window_bounds = array<i64: 256, 128>}, {transform_indices = @transform_5, window_bounds = array<i64: 1, 128>}, {transform_indices = @transform_6, window_bounds = array<i64: 32, 128>}]} {
    %c0_i32 = arith.constant 0 : i32
    %0 = arith.cmpi eq, %arg0, %c0_i32 : i32
    %1 = arith.extui %0 : i1 to i32
    %c0_i32_0 = arith.constant 0 : i32
    %2 = arith.cmpi ne, %1, %c0_i32_0 : i32
    scf.if %2 {
      %c0_8 = arith.constant 0 : index
      %c0_9 = arith.constant 0 : index
      %10 = vector.load %arg1[%c0_8, %c0_9] : memref<32x512xbf16, #tpu.memory_space<vmem>>, vector<32x512xbf16>
      %c0_10 = arith.constant 0 : index
      %c0_11 = arith.constant 0 : index
      %11 = vector.load %arg2[%c0_10, %c0_11] : memref<512x256xbf16, #tpu.memory_space<vmem>>, vector<512x256xbf16>
      %cst_12 = arith.constant dense<0.000000e+00> : vector<32x256xf32>
      %12 = tpu.matmul %10, %11, %cst_12 {dimension_numbers = #tpu.dot_dimension_numbers<[1], [0], [0], [1], [0, 0, 1, 1], [], []>} : vector<32x512xbf16>, vector<512x256xbf16>, vector<32x256xf32> -> vector<32x256xf32>
      %cst_13 = arith.constant dense<0.000000e+00> : vector<256xf32>
      %13 = vector.multi_reduction <add>, %12, %cst_13 [0] : vector<32x256xf32> to vector<256xf32>
      %14 = vector.shape_cast %13 : vector<256xf32> to vector<1x256xf32>
      %cst_14 = arith.constant 3.125000e-02 : f32
      %15 = vector.broadcast %cst_14 : f32 to vector<1x256xf32>
      %16 = arith.mulf %14, %15 : vector<1x256xf32>
      %17 = arith.mulf %12, %12 : vector<32x256xf32>
      %cst_15 = arith.constant dense<0.000000e+00> : vector<256xf32>
      %18 = vector.multi_reduction <add>, %17, %cst_15 [0] : vector<32x256xf32> to vector<256xf32>
      %19 = vector.shape_cast %18 : vector<256xf32> to vector<1x256xf32>
      %cst_16 = arith.constant 3.125000e-02 : f32
      %20 = vector.broadcast %cst_16 : f32 to vector<1x256xf32>
      %21 = arith.mulf %19, %20 : vector<1x256xf32>
      %22 = arith.mulf %16, %16 : vector<1x256xf32>
      %23 = arith.subf %21, %22 : vector<1x256xf32>
      %cst_17 = arith.constant 9.99999974E-6 : f32
      %24 = vector.broadcast %cst_17 : f32 to vector<1x256xf32>
      %25 = arith.addf %23, %24 : vector<1x256xf32>
      %26 = math.rsqrt %25 : vector<1x256xf32>
      %c0_18 = arith.constant 0 : index
      %c0_19 = arith.constant 0 : index
      %27 = vector.load %arg3[%c0_18, %c0_19] : memref<1x256xf32, #tpu.memory_space<vmem>>, vector<1x256xf32>
      %28 = arith.mulf %27, %26 : vector<1x256xf32>
      %c0_20 = arith.constant 0 : index
      %c0_21 = arith.constant 0 : index
      %29 = vector.load %arg4[%c0_20, %c0_21] : memref<1x256xf32, #tpu.memory_space<vmem>>, vector<1x256xf32>
      %30 = arith.mulf %16, %28 : vector<1x256xf32>
      %31 = arith.subf %29, %30 : vector<1x256xf32>
      %32 = vector.broadcast %28 : vector<1x256xf32> to vector<32x256xf32>
      %33 = arith.mulf %12, %32 : vector<32x256xf32>
      %34 = vector.broadcast %31 : vector<1x256xf32> to vector<32x256xf32>
      %35 = arith.addf %33, %34 : vector<32x256xf32>
      %cst_22 = arith.constant 0.000000e+00 : f32
      %36 = vector.broadcast %cst_22 : f32 to vector<32x256xf32>
      %37 = arith.maximumf %35, %36 : vector<32x256xf32>
      %38 = arith.truncf %37 : vector<32x256xf32> to vector<32x256xbf16>
      %c0_23 = arith.constant 0 : index
      %c0_24 = arith.constant 0 : index
      %39 = vector.load %arg8[%c0_23, %c0_24] : memref<32x256xbf16, #tpu.memory_space<vmem>>, vector<32x256xbf16>
      tpu.vector_store %arg8[%c0_23, %c0_24], %38 {strides = array<i32>} : memref<32x256xbf16, #tpu.memory_space<vmem>>, vector<32x256xbf16>,
    } else {
    }
    %c0 = arith.constant 0 : index
    %c0_1 = arith.constant 0 : index
    %3 = vector.load %arg8[%c0, %c0_1] : memref<32x256xbf16, #tpu.memory_space<vmem>>, vector<32x256xbf16>
    %c0_2 = arith.constant 0 : index
    %c0_3 = arith.constant 0 : index
    %4 = vector.load %arg5[%c0_2, %c0_3] : memref<256x128xbf16, #tpu.memory_space<vmem>>, vector<256x128xbf16>
    %cst = arith.constant dense<0.000000e+00> : vector<32x128xf32>
    %5 = tpu.matmul %3, %4, %cst {dimension_numbers = #tpu.dot_dimension_numbers<[1], [0], [0], [1], [0, 0, 1, 1], [], []>} : vector<32x256xbf16>, vector<256x128xbf16>, vector<32x128xf32> -> vector<32x128xf32>
    %c0_4 = arith.constant 0 : index
    %c0_5 = arith.constant 0 : index
    %6 = vector.load %arg6[%c0_4, %c0_5] : memref<1x128xf32, #tpu.memory_space<vmem>>, vector<1x128xf32>
    %7 = vector.broadcast %6 : vector<1x128xf32> to vector<32x128xf32>
    %8 = arith.addf %5, %7 : vector<32x128xf32>
    %c0_6 = arith.constant 0 : index
    %c0_7 = arith.constant 0 : index
    %9 = vector.load %arg7[%c0_6, %c0_7] : memref<32x128xf32, #tpu.memory_space<vmem>>, vector<32x128xf32>
    tpu.vector_store %arg7[%c0_6, %c0_7], %8 {strides = array<i32>} : memref<32x128xf32, #tpu.memory_space<vmem>>, vector<32x128xf32>,
    return
  }
  func.func @transform_0(%arg0: i32) -> (i32, i32) {
    %c0_i32 = arith.constant 0 : i32
    %c0_i32_0 = arith.constant 0 : i32
    %c0_i32_1 = arith.constant 0 : i32
    return %c0_i32, %c0_i32_0 : i32, i32
  }
  func.func @transform_1(%arg0: i32) -> (i32, i32) {
    %c0_i32 = arith.constant 0 : i32
    %c0_i32_0 = arith.constant 0 : i32
    %c0_i32_1 = arith.constant 0 : i32
    return %c0_i32, %c0_i32_0 : i32, i32
  }
  func.func @transform_2(%arg0: i32) -> (i32, i32) {
    %c0_i32 = arith.constant 0 : i32
    %c0_i32_0 = arith.constant 0 : i32
    %c0_i32_1 = arith.constant 0 : i32
    return %c0_i32, %c0_i32_0 : i32, i32
  }
  func.func @transform_3(%arg0: i32) -> (i32, i32) {
    %c0_i32 = arith.constant 0 : i32
    %c0_i32_0 = arith.constant 0 : i32
    %c0_i32_1 = arith.constant 0 : i32
    return %c0_i32, %c0_i32_0 : i32, i32
  }
  func.func @transform_4(%arg0: i32) -> (i32, i32) {
    %c0_i32 = arith.constant 0 : i32
    %c0_i32_0 = arith.constant 0 : i32
    return %c0_i32, %arg0 : i32, i32
  }
  func.func @transform_5(%arg0: i32) -> (i32, i32) {
    %c0_i32 = arith.constant 0 : i32
    %c0_i32_0 = arith.constant 0 : i32
    return %c0_i32, %arg0 : i32, i32
  }
  func.func @transform_6(%arg0: i32) -> (i32, i32) {
    %c0_i32 = arith.constant 0 : i32
    %c0_i32_0 = arith.constant 0 : i32
    return %c0_i32, %arg0 : i32, i32
  }
}

</mosaic_0001>

<bundles_post_ra>
// kernel: tpu_custom_call.1
= control target key start
LH: loop header
LB: loop body
LE: loop exit
PB: predicated region body
PF: predicated region fallthrough
CT: control target
= control target key end

     0   :  { %11 = vsyncpa [#allocation4], 0  ;;  %s1501_s0 = inlined_call_operand.hbm [shape: bf16[32,512], index: 0, kind: input, shape index: {}]   ;;  %s1502_s1 = inlined_call_operand.hbm [shape: bf16[512,256], index: 1, kind: input, shape index: {}]   ;;  %s1503_s2 = inlined_call_operand.vmem [shape: f32[1,256], index: 2, kind: input, shape index: {}]   ;;  %s1504_s3 = inlined_call_operand.vmem [shape: f32[1,256], index: 3, kind: input, shape index: {}]   ;;  %s1505_s4 = inlined_call_operand.hbm [shape: bf16[256,128], index: 4, kind: input, shape index: {}]   ;;  %s1506_s5 = inlined_call_operand.vmem [shape: f32[1,128], index: 5, kind: input, shape index: {}]   ;;  %s1507_s6 = inlined_call_operand.hbm [shape: f32[32,128], index: 6, kind: output, shape index: {}]  }
   0x1   :  { %12 = vsyncpa [#allocation7], 0 }
   0x2   :  { %13 = vsyncpa [#allocation5], 0  ;;  %s1344_s21 = smov [#allocation6]   ;;  %s1250_s25 = scalar_lea.hbm %s1502_s1, 8192 }
   0x3   :  { %s31_s22 = sshll.u32 %s1344_s21, 4  ;;  %p1251_p0 = scmp.ne.s32.totalorder %s1502_s1, %s1250_s25  ;;  %s32_s22 = int_to_ptr.vmem [resolvable:$true] %s31_s22 }
   0x4   :  { %p1254_p1 = scmp.lt.u32.totalorder %s1250_s25, %s1502_s1 }
   0x6   :  { %p1256_p2 = pnand %p1254_p1, %p1251_p0 }
   0x8   :  { %1259 = shalt.err (!%p1256_p2)
}
   0x9   :  { %s1260_s30 = scalar_lea.vmem %s32_s22, 8192  ;;  %p1265_p4 = scmp.lt.s32.totalorder %s32_s22, %s32_s22 }
   0xa   :  { %p1261_p3 = scmp.ne.s32.totalorder %s32_s22, %s1260_s30  ;;  %p1266_p5 = scmp.lt.s32.totalorder %s1260_s30, %s1260_s30 }
   0xc   :  { %p1267_p6 = por %p1266_p5, %p1265_p4 }
   0xe   :  { %p1268_p7 = pnand %p1267_p6, %p1261_p3 }
  0x10   :  { %1271 = shalt.err (!%p1268_p7)
}
  0x11   :  { %s1345_s7 = smov 128   ;;  %s1346_s8 = smov 8  }
  0x12   :  { %37 = dma.hbm_to_vmem [thread:$0]  %s1502_s1, 8192, %s32_s22, [#allocation7], %s1345_s7, %s1345_s7, %s1346_s8  }
  0x13   :  { %s1347_s11 = smov [#allocation3]   ;;  %s1272_s15 = scalar_lea.hbm %s1501_s0, 1024 }
  0x14   :  { %s19_s12 = sshll.u32 %s1347_s11, 4  ;;  %p1273_p8 = scmp.ne.s32.totalorder %s1501_s0, %s1272_s15  ;;  %s20_s12 = int_to_ptr.vmem [resolvable:$true] %s19_s12 }
  0x15   :  { %p1276_p9 = scmp.lt.u32.totalorder %s1272_s15, %s1501_s0 }
  0x17   :  { %p1278_p10 = pnand %p1276_p9, %p1273_p8 }
  0x19   :  { %1281 = shalt.err (!%p1278_p10)
}
  0x1a   :  { %s1282_s20 = scalar_lea.vmem %s20_s12, 1024  ;;  %p1287_p12 = scmp.lt.s32.totalorder %s20_s12, %s20_s12 }
  0x1b   :  { %p1283_p11 = scmp.ne.s32.totalorder %s20_s12, %s1282_s20  ;;  %p1288_p13 = scmp.lt.s32.totalorder %s1282_s20, %s1282_s20 }
  0x1d   :  { %p1289_p0 = por %p1288_p13, %p1287_p12 }
  0x1f   :  { %p1290_p1 = pnand %p1289_p0, %p1283_p11 }
  0x21   :  { %1293 = shalt.err (!%p1290_p1)
}
  0x22   :  { %s1348_s1 = smov 256   ;;  %s1349_s21 = smov 16  }
  0x23   :  { %25 = dma.hbm_to_vmem [thread:$0]  %s1501_s0, 1024, %s20_s12, [#allocation4], %s1348_s1, %s1348_s1, %s1349_s21  }
  0x24   :  { %s1350_s24 = smov [#allocation8]   ;;  %s1294_s28 = scalar_lea.hbm %s1505_s4, 2048 }
  0x25   :  { %s47_s25 = sshll.u32 %s1350_s24, 4  ;;  %p1295_p2 = scmp.ne.s32.totalorder %s1505_s4, %s1294_s28  ;;  %s48_s25 = int_to_ptr.vmem [resolvable:$true] %s47_s25 }
  0x26   :  { %p1298_p3 = scmp.lt.u32.totalorder %s1294_s28, %s1505_s4 }
  0x28   :  { %p1300_p4 = pnand %p1298_p3, %p1295_p2 }
  0x2a   :  { %1303 = shalt.err (!%p1300_p4)
}
  0x2b   :  { %s1304_s11 = scalar_lea.vmem %s48_s25, 2048  ;;  %p1309_p6 = scmp.lt.s32.totalorder %s48_s25, %s48_s25 }
  0x2c   :  { %p1305_p5 = scmp.ne.s32.totalorder %s48_s25, %s1304_s11  ;;  %p1310_p7 = scmp.lt.s32.totalorder %s1304_s11, %s1304_s11 }
  0x2e   :  { %p1311_p8 = por %p1310_p7, %p1309_p6 }
  0x30   :  { %p1312_p9 = pnand %p1311_p8, %p1305_p5 }
  0x32   :  { %1315 = shalt.err (!%p1312_p9)
}
  0x33   :  { %s1351_s0 = smov 64   ;;  %s1352_s12 = smov 4  }
  0x34   :  { %53 = dma.hbm_to_vmem [thread:$0]  %s1505_s4, 2048, %s48_s25, [#allocation7], %s1351_s0, %s1351_s0, %s1352_s12  }
  0x35   :  { %1338 = dma.done.wait [#allocation4], 1024  }
  0x36   :  { %1339 = vsyncadd [#allocation4], 4294966272 }
  0x37   :  { %1340 = dma.done.wait [#allocation7], 10240  }
  0x38   :  { %1341 = vsyncadd [#allocation7], 4294957056  ;;  %v1122_v0 = vld [vmem:[#allocation6 + $0x4] ss:$8 sps:$4 sm:$0xff]   ;;  %v1126_v2 = vld [vmem:[#allocation6] ss:$8 sps:$4 sm:$0xff]  }
  0x39   :  { %v1124_v1 = vld [vmem:[#allocation6 + $0x104] ss:$8 sps:$4 sm:$0xff]   ;;  %502 = vmatprep.subr.bf16.mxu1 %v1122_v0  ;;  %v1127_v3 = vld [vmem:[#allocation6 + $0x100] ss:$8 sps:$4 sm:$0xff]   ;;  %v1128_v4 = vld [vmem:[#allocation6 + $0x14] ss:$8 sps:$4 sm:$0xff]  }
  0x3a   :  { %555 = vmatprep.subr.bf16.mxu0 %v1124_v1  ;;  %503 = vmatpush1.bf16.msra.mxu1 %v1126_v2  ;;  %v1130_v5 = vld [vmem:[#allocation6 + $0x114] ss:$8 sps:$4 sm:$0xff]   ;;  %v1132_v6 = vld [vmem:[#allocation6 + $0x10] ss:$8 sps:$4 sm:$0xff]   ;;  %v1134_v8 = vld [vmem:[#allocation6 + $0x24] ss:$8 sps:$4 sm:$0xff]  }
  0x3b   :  { %556 = vmatpush1.bf16.msra.mxu0 %v1127_v3  ;;  %504 = vmatprep.subr.bf16.mxu1 %v1128_v4  ;;  %v1133_v7 = vld [vmem:[#allocation6 + $0x110] ss:$8 sps:$4 sm:$0xff]   ;;  %v1136_v9 = vld [vmem:[#allocation6 + $0x124] ss:$8 sps:$4 sm:$0xff]   ;;  %v1138_v10 = vld [vmem:[#allocation6 + $0x20] ss:$8 sps:$4 sm:$0xff]  }
  0x3c   :  { %557 = vmatprep.subr.bf16.mxu0 %v1130_v5  ;;  %v1139_v11 = vld [vmem:[#allocation6 + $0x120] ss:$8 sps:$4 sm:$0xff]   ;;  %v1140_v12 = vld [vmem:[#allocation6 + $0x34] ss:$8 sps:$4 sm:$0xff]   ;;  %v1144_v14 = vld [vmem:[#allocation6 + $0x30] ss:$8 sps:$4 sm:$0xff]  }
  0x3d   :  { %v1142_v13 = vld [vmem:[#allocation6 + $0x134] ss:$8 sps:$4 sm:$0xff]   ;;  %v1145_v15 = vld [vmem:[#allocation6 + $0x130] ss:$8 sps:$4 sm:$0xff]   ;;  %v1146_v16 = vld [vmem:[#allocation6 + $0x44] ss:$8 sps:$4 sm:$0xff]  }
  0x3e   :  { %505 = vmatpush1.bf16.msra.mxu1 %v1132_v6  ;;  %v1148_v17 = vld [vmem:[#allocation6 + $0x144] ss:$8 sps:$4 sm:$0xff]   ;;  %v1150_v18 = vld [vmem:[#allocation6 + $0x40] ss:$8 sps:$4 sm:$0xff]   ;;  %v1152_v20 = vld [vmem:[#allocation6 + $0x54] ss:$8 sps:$4 sm:$0xff]  }
  0x3f   :  { %558 = vmatpush1.bf16.msra.mxu0 %v1133_v7  ;;  %506 = vmatprep.subr.bf16.mxu1 %v1134_v8  ;;  %v1151_v19 = vld [vmem:[#allocation6 + $0x140] ss:$8 sps:$4 sm:$0xff]   ;;  %v1154_v21 = vld [vmem:[#allocation6 + $0x154] ss:$8 sps:$4 sm:$0xff]   ;;  %v1156_v22 = vld [vmem:[#allocation6 + $0x50] ss:$8 sps:$4 sm:$0xff]  }
  0x40   :  { %559 = vmatprep.subr.bf16.mxu0 %v1136_v9  ;;  %v1157_v23 = vld [vmem:[#allocation6 + $0x150] ss:$8 sps:$4 sm:$0xff]   ;;  %v1158_v24 = vld [vmem:[#allocation6 + $0x64] ss:$8 sps:$4 sm:$0xff]   ;;  %v1162_v26 = vld [vmem:[#allocation6 + $0x60] ss:$8 sps:$4 sm:$0xff]  }
  0x41   :  { %v1160_v25 = vld [vmem:[#allocation6 + $0x164] ss:$8 sps:$4 sm:$0xff]   ;;  %v1163_v27 = vld [vmem:[#allocation6 + $0x160] ss:$8 sps:$4 sm:$0xff]   ;;  %v1164_v28 = vld [vmem:[#allocation6 + $0x74] ss:$8 sps:$4 sm:$0xff]  }
  0x42   :  { %507 = vmatpush1.bf16.msra.mxu1 %v1138_v10  ;;  %v1166_v29 = vld [vmem:[#allocation6 + $0x174] ss:$8 sps:$4 sm:$0xff]   ;;  %v1168_v30 = vld [vmem:[#allocation6 + $0x70] ss:$8 sps:$4 sm:$0xff]   ;;  %v1170_v32 = vld [vmem:[#allocation6 + $0x84] ss:$8 sps:$4 sm:$0xff]  }
  0x43   :  { %560 = vmatpush1.bf16.msra.mxu0 %v1139_v11  ;;  %508 = vmatprep.subr.bf16.mxu1 %v1140_v12  ;;  %v1169_v31 = vld [vmem:[#allocation6 + $0x170] ss:$8 sps:$4 sm:$0xff]   ;;  %v1172_v33 = vld [vmem:[#allocation6 + $0x184] ss:$8 sps:$4 sm:$0xff]   ;;  %v1174_v34 = vld [vmem:[#allocation6 + $0x80] ss:$8 sps:$4 sm:$0xff]  }
  0x44   :  { %561 = vmatprep.subr.bf16.mxu0 %v1142_v13  ;;  %v1175_v35 = vld [vmem:[#allocation6 + $0x180] ss:$8 sps:$4 sm:$0xff]   ;;  %v1176_v36 = vld [vmem:[#allocation6 + $0x94] ss:$8 sps:$4 sm:$0xff]   ;;  %v1180_v38 = vld [vmem:[#allocation6 + $0x90] ss:$8 sps:$4 sm:$0xff]  }
  0x45   :  { %v1178_v37 = vld [vmem:[#allocation6 + $0x194] ss:$8 sps:$4 sm:$0xff]   ;;  %v1181_v39 = vld [vmem:[#allocation6 + $0x190] ss:$8 sps:$4 sm:$0xff]   ;;  %v1182_v40 = vld [vmem:[#allocation6 + $0xa4] ss:$8 sps:$4 sm:$0xff]  }
  0x46   :  { %509 = vmatpush1.bf16.msra.mxu1 %v1144_v14  ;;  %v1184_v41 = vld [vmem:[#allocation6 + $0x1a4] ss:$8 sps:$4 sm:$0xff]   ;;  %v1186_v42 = vld [vmem:[#allocation6 + $0xa0] ss:$8 sps:$4 sm:$0xff]   ;;  %v1188_v44 = vld [vmem:[#allocation6 + $0xb4] ss:$8 sps:$4 sm:$0xff]  }
  0x47   :  { %562 = vmatpush1.bf16.msra.mxu0 %v1145_v15  ;;  %510 = vmatprep.subr.bf16.mxu1 %v1146_v16  ;;  %v1187_v43 = vld [vmem:[#allocation6 + $0x1a0] ss:$8 sps:$4 sm:$0xff]   ;;  %v1190_v45 = vld [vmem:[#allocation6 + $0x1b4] ss:$8 sps:$4 sm:$0xff]   ;;  %v1192_v46 = vld [vmem:[#allocation6 + $0xb0] ss:$8 sps:$4 sm:$0xff]  }
  0x48   :  { %563 = vmatprep.subr.bf16.mxu0 %v1148_v17  ;;  %v1193_v47 = vld [vmem:[#allocation6 + $0x1b0] ss:$8 sps:$4 sm:$0xff]   ;;  %v1194_v48 = vld [vmem:[#allocation6 + $0xc4] ss:$8 sps:$4 sm:$0xff]   ;;  %v1198_v52 = vld [vmem:[#allocation6 + $0xc0] ss:$8 sps:$4 sm:$0xff]  }
  0x49   :  { %v1220_v49 = vld [vmem:[#allocation3 + $0x4] ss:$16 sps:$4 sm:$0xff]   ;;  %v1223_v51 = vld [vmem:[#allocation3 + $0xc] ss:$16 sps:$4 sm:$0xff]   ;;  %v1199_v53 = vld [vmem:[#allocation6 + $0x1c0] ss:$8 sps:$4 sm:$0xff]  }
  0x4a   :  { %511 = vmatpush1.bf16.msra.mxu1 %v1150_v18  ;;  %v1196_v50 = vld [vmem:[#allocation6 + $0x1c4] ss:$8 sps:$4 sm:$0xff]   ;;  %534 = vmatprep.mubr.bf16.mxu1 %v1220_v49  ;;  %v1200_v54 = vld [vmem:[#allocation6 + $0xd4] ss:$8 sps:$4 sm:$0xff]   ;;  %v1204_v56 = vld [vmem:[#allocation6 + $0xd0] ss:$8 sps:$4 sm:$0xff]  }
  0x4b   :  { %564 = vmatpush1.bf16.msra.mxu0 %v1151_v19  ;;  %512 = vmatprep.subr.bf16.mxu1 %v1152_v20  ;;  %v1202_v55 = vld [vmem:[#allocation6 + $0x1d4] ss:$8 sps:$4 sm:$0xff]   ;;  %v1205_v57 = vld [vmem:[#allocation6 + $0x1d0] ss:$8 sps:$4 sm:$0xff]   ;;  %v1206_v58 = vld [vmem:[#allocation6 + $0xe4] ss:$8 sps:$4 sm:$0xff]  }
  0x4c   :  { %565 = vmatprep.subr.bf16.mxu0 %v1154_v21  ;;  %587 = vmatprep.mubr.bf16.mxu0 %v1223_v51  ;;  %v1208_v59 = vld [vmem:[#allocation6 + $0x1e4] ss:$8 sps:$4 sm:$0xff]   ;;  %v1210_v60 = vld [vmem:[#allocation6 + $0xe0] ss:$8 sps:$4 sm:$0xff]   ;;  %v1212_v62 = vld [vmem:[#allocation6 + $0xf4] ss:$8 sps:$4 sm:$0xff]  }
  0x4d   :  { %v1211_v61 = vld [vmem:[#allocation6 + $0x1e0] ss:$8 sps:$4 sm:$0xff]   ;;  %v1214_v63 = vld [vmem:[#allocation6 + $0x1f4] ss:$8 sps:$4 sm:$0xff]   ;;  %v1216_v0 = vld [vmem:[#allocation6 + $0xf0] ss:$8 sps:$4 sm:$0xff]  }
  0x4e   :  { %513 = vmatpush1.bf16.msra.mxu1 %v1156_v22  ;;  %v1217_v1 = vld [vmem:[#allocation6 + $0x1f0] ss:$8 sps:$4 sm:$0xff]   ;;  %v1224_v4 = vld [vmem:[#allocation3 + $0x24] ss:$16 sps:$4 sm:$0xff]   ;;  %v1226_v5 = vld [vmem:[#allocation3 + $0x2c] ss:$16 sps:$4 sm:$0xff]  }
  0x4f   :  { %566 = vmatpush1.bf16.msra.mxu0 %v1157_v23  ;;  %514 = vmatprep.subr.bf16.mxu1 %v1158_v24  ;;  %v1218_v2 = vld [vmem:[#allocation3] ss:$16 sps:$4 sm:$0xff]   ;;  %v1221_v3 = vld [vmem:[#allocation3 + $0x8] ss:$16 sps:$4 sm:$0xff]   ;;  %s1354_s18 = smov [#allocation9]  }
  0x50   :  { %567 = vmatprep.subr.bf16.mxu0 %v1160_v25  ;;  %v1228_v6 = vld [vmem:[#allocation3 + $0x20] ss:$16 sps:$4 sm:$0xff]   ;;  %v1229_v7 = vld [vmem:[#allocation3 + $0x28] ss:$16 sps:$4 sm:$0xff]   ;;  %s957_s19 = sshll.u32 %s1354_s18, 4  ;;  %s958_s19 = int_to_ptr.vmem [resolvable:$true] %s957_s19 }
  0x51   :  { %v1230_v8 = vld [vmem:[#allocation8 + $0x40] sm:$0xff]   ;;  %v1232_v10 = vld [vmem:[#allocation8 + $0x48] sm:$0xff]   ;;  %v1234_v12 = vld [vmem:[#allocation8 + $0x50] sm:$0xff]   ;;  %p1321_p11 = scmp.lt.s32.totalorder %s958_s19, %s958_s19 }
  0x52   :  { %515 = vmatpush1.bf16.msra.mxu1 %v1162_v26  ;;  %v1231_v9 = vld [vmem:[#allocation8] sm:$0xff]   ;;  %v1233_v11 = vld [vmem:[#allocation8 + $0x8] sm:$0xff]   ;;  %v1235_v13 = vld [vmem:[#allocation8 + $0x10] sm:$0xff]  }
  0x53   :  { %568 = vmatpush1.bf16.msra.mxu0 %v1163_v27  ;;  %516 = vmatprep.subr.bf16.mxu1 %v1164_v28  ;;  %v1236_v14 = vld [vmem:[#allocation8 + $0x58] sm:$0xff]   ;;  %v1238_v16 = vld [vmem:[#allocation8 + $0x60] sm:$0xff]   ;;  %v1240_v18 = vld [vmem:[#allocation8 + $0x68] sm:$0xff]  }
  0x54   :  { %569 = vmatprep.subr.bf16.mxu0 %v1166_v29  ;;  %v1237_v15 = vld [vmem:[#allocation8 + $0x18] sm:$0xff]   ;;  %v1239_v17 = vld [vmem:[#allocation8 + $0x20] sm:$0xff]   ;;  %v1241_v19 = vld [vmem:[#allocation8 + $0x28] sm:$0xff]  }
  0x55   :  { %v1242_v20 = vld [vmem:[#allocation8 + $0x70] sm:$0xff]   ;;  %v1244_v22 = vld [vmem:[#allocation8 + $0x78] sm:$0xff]  }
  0x56   :  { %517 = vmatpush1.bf16.msra.mxu1 %v1168_v30  ;;  %v1243_v21 = vld [vmem:[#allocation8 + $0x30] sm:$0xff]   ;;  %v1245_v23 = vld [vmem:[#allocation8 + $0x38] sm:$0xff]  }
  0x57   :  { %570 = vmatpush1.bf16.msra.mxu0 %v1169_v31  ;;  %518 = vmatprep.subr.bf16.mxu1 %v1170_v32 }
  0x58   :  { %571 = vmatprep.subr.bf16.mxu0 %v1172_v33 }
  0x5a   :  { %519 = vmatpush1.bf16.msra.mxu1 %v1174_v34 }
  0x5b   :  { %572 = vmatpush1.bf16.msra.mxu0 %v1175_v35  ;;  %520 = vmatprep.subr.bf16.mxu1 %v1176_v36 }
  0x5c   :  { %573 = vmatprep.subr.bf16.mxu0 %v1178_v37 }
  0x5e   :  { %521 = vmatpush1.bf16.msra.mxu1 %v1180_v38 }
  0x5f   :  { %574 = vmatpush1.bf16.msra.mxu0 %v1181_v39  ;;  %522 = vmatprep.subr.bf16.mxu1 %v1182_v40 }
  0x60   :  { %575 = vmatprep.subr.bf16.mxu0 %v1184_v41 }
  0x62   :  { %523 = vmatpush1.bf16.msra.mxu1 %v1186_v42 }
  0x63   :  { %576 = vmatpush1.bf16.msra.mxu0 %v1187_v43  ;;  %524 = vmatprep.subr.bf16.mxu1 %v1188_v44 }
  0x64   :  { %577 = vmatprep.subr.bf16.mxu0 %v1190_v45 }
  0x66   :  { %525 = vmatpush1.bf16.msra.mxu1 %v1192_v46 }
  0x67   :  { %578 = vmatpush1.bf16.msra.mxu0 %v1193_v47  ;;  %526 = vmatprep.subr.bf16.mxu1 %v1194_v48 }
  0x68   :  { %579 = vmatprep.subr.bf16.mxu0 %v1196_v50 }
  0x6a   :  { %527 = vmatpush1.bf16.msra.mxu1 %v1198_v52 }
  0x6b   :  { %580 = vmatpush1.bf16.msra.mxu0 %v1199_v53  ;;  %528 = vmatprep.subr.bf16.mxu1 %v1200_v54 }
  0x6c   :  { %581 = vmatprep.subr.bf16.mxu0 %v1202_v55 }
  0x6e   :  { %529 = vmatpush1.bf16.msra.mxu1 %v1204_v56 }
  0x6f   :  { %582 = vmatpush1.bf16.msra.mxu0 %v1205_v57  ;;  %530 = vmatprep.subr.bf16.mxu1 %v1206_v58 }
  0x70   :  { %583 = vmatprep.subr.bf16.mxu0 %v1208_v59 }
  0x72   :  { %531 = vmatpush1.bf16.msra.mxu1 %v1210_v60 }
  0x73   :  { %584 = vmatpush1.bf16.msra.mxu0 %v1211_v61  ;;  %532 = vmatprep.subr.bf16.mxu1 %v1212_v62 }
  0x74   :  { %585 = vmatprep.subr.bf16.mxu0 %v1214_v63 }
  0x76   :  { %533 = vmatpush1.bf16.msra.mxu1 %v1216_v0 }
  0x77   :  { %586 = vmatpush1.bf16.msra.mxu0 %v1217_v1  ;;  %1087 = vmatprep.subr.bf16.mxu1 %v1230_v8 }
  0x78   :  { %1059 = vmatprep.subr.bf16.mxu0 %v1230_v8 }
  0x79   :  { %535 = vmatmul.mubr.bf16.vlgmr.msra.gmra.mrb[0].mxu1 %v1218_v2 }
  0x7a   :  { %588 = vmatmul.mubr.bf16.vlgmr.msra.gmra.mrb[0].mxu0 %v1221_v3  ;;  %544 = vmatprep.mubr.bf16.mxu1 %v1224_v4 }
  0x7b   :  { %597 = vmatprep.mubr.bf16.mxu0 %v1226_v5  ;;  %1060 = vmatpush3.bf16.msra.mxu0 %v1231_v9 }
  0x7c   :  { %1095 = vmatpush3.bf16.msra.mxu1 %v1231_v9  ;;  %1061 = vmatprep.subr.bf16.mxu0 %v1232_v10 }
  0x7d   :  { %1088 = vmatprep.subr.bf16.mxu1 %v1232_v10 }
  0x7f   :  { %1062 = vmatpush3.bf16.msra.mxu0 %v1233_v11 }
  0x80   :  { %1096 = vmatpush3.bf16.msra.mxu1 %v1233_v11  ;;  %1063 = vmatprep.subr.bf16.mxu0 %v1234_v12 }
  0x81   :  { %545 = vmatmul.mubr.bf16.gmra.mrb[4].mxu1 %v1228_v6  ;;  %1089 = vmatprep.subr.bf16.mxu1 %v1234_v12 }
  0x82   :  { %598 = vmatmul.mubr.bf16.gmra.mrb[4].mxu0 %v1229_v7 }
  0x83   :  { %1064 = vmatpush3.bf16.msra.mxu0 %v1235_v13 }
  0x84   :  { %1097 = vmatpush3.bf16.msra.mxu1 %v1235_v13  ;;  %1065 = vmatprep.subr.bf16.mxu0 %v1236_v14 }
  0x85   :  { %1090 = vmatprep.subr.bf16.mxu1 %v1236_v14 }
  0x87   :  { %1066 = vmatpush3.bf16.msra.mxu0 %v1237_v15 }
  0x88   :  { %1098 = vmatpush3.bf16.msra.mxu1 %v1237_v15  ;;  %1067 = vmatprep.subr.bf16.mxu0 %v1238_v16 }
  0x89   :  { %1091 = vmatprep.subr.bf16.mxu1 %v1238_v16 }
  0x8b   :  { %1068 = vmatpush3.bf16.msra.mxu0 %v1239_v17 }
  0x8c   :  { %1099 = vmatpush3.bf16.msra.mxu1 %v1239_v17  ;;  %1069 = vmatprep.subr.bf16.mxu0 %v1240_v18 }
  0x8d   :  { %1092 = vmatprep.subr.bf16.mxu1 %v1240_v18 }
  0x8f   :  { %1070 = vmatpush3.bf16.msra.mxu0 %v1241_v19 }
  0x90   :  { %1100 = vmatpush3.bf16.msra.mxu1 %v1241_v19  ;;  %1071 = vmatprep.subr.bf16.mxu0 %v1242_v20 }
  0x91   :  { %1093 = vmatprep.subr.bf16.mxu1 %v1242_v20 }
  0x93   :  { %1072 = vmatpush3.bf16.msra.mxu0 %v1243_v21 }
  0x94   :  { %1101 = vmatpush3.bf16.msra.mxu1 %v1243_v21  ;;  %1073 = vmatprep.subr.bf16.mxu0 %v1244_v22 }
  0x95   :  { %1094 = vmatprep.subr.bf16.mxu1 %v1244_v22 }
  0x97   :  { %1074 = vmatpush3.bf16.msra.mxu0 %v1245_v23 }
  0x98   :  { %1102 = vmatpush3.bf16.msra.mxu1 %v1245_v23 }
 0x14c   :  { %v536_v24 = vpop.f32.mrb[0].mxu1 }
 0x14d   :  { %v589_v25 = vpop.f32.mrb[0].mxu0  ;;  %v538_v27 = vpop.f32.mrb[1].mxu1 }
 0x14e   :  { %v1429_v26 = vadd.f32 %v589_v25, %v536_v24  ;;  %v591_v28 = vpop.f32.mrb[1].mxu0  ;;  %v540_v30 = vpop.f32.mrb[2].mxu1 }
 0x14f   :  { %v1431_v29 = vadd.f32 %v591_v28, %v538_v27  ;;  %v593_v31 = vpop.f32.mrb[2].mxu0  ;;  %v542_v33 = vpop.f32.mrb[3].mxu1 }
 0x150   :  { %v1433_v32 = vadd.f32 %v593_v31, %v540_v30  ;;  %v595_v34 = vpop.f32.mrb[3].mxu0  ;;  %v628_v36 = vmul.f32 %v1429_v26, %v1429_v26 }
 0x151   :  { %v1435_v35 = vadd.f32 %v595_v34, %v542_v33  ;;  %v629_v39 = vmul.f32 %v1431_v29, %v1431_v29 }
 0x152   :  { %v608_v37 = vadd.f32 %v1433_v32, %v1429_v26  ;;  %v630_v38 = vmul.f32 %v1433_v32, %v1433_v32 }
 0x153   :  { %v617_v40 = vadd.f32 %v1435_v35, %v1431_v29  ;;  %v631_v41 = vmul.f32 %v1435_v35, %v1435_v35 }
 0x154   :  { %v636_v42 = vadd.f32 %v630_v38, %v628_v36  ;;  %v546_v44 = vpop.f32.mrb[4].mxu1 }
 0x155   :  { %v645_v43 = vadd.f32 %v631_v41, %v629_v39  ;;  %v599_v45 = vpop.f32.mrb[4].mxu0  ;;  %v548_v47 = vpop.f32.mrb[5].mxu1 }
 0x156   :  { %v1449_v46 = vadd.f32 %v599_v45, %v546_v44  ;;  %v601_v48 = vpop.f32.mrb[5].mxu0  ;;  %v550_v50 = vpop.f32.mrb[6].mxu1  ;;  %v671_v44 = vlaneseq }
 0x157   :  { %v1451_v49 = vadd.f32 %v601_v48, %v548_v47  ;;  %v603_v51 = vpop.f32.mrb[6].mxu0  ;;  %v552_v55 = vpop.f32.mrb[7].mxu1 }
 0x158   :  { %v609_v52 = vadd.f32 %v608_v37, %v1449_v46  ;;  %v632_v53 = vmul.f32 %v1449_v46, %v1449_v46  ;;  %v1456_v54 = vadd.f32 %v603_v51, %v550_v50  ;;  %v605_v56 = vpop.f32.mrb[7].mxu0  ;;  %v672_v47 = vshrl.u32 %v671_v44, 7 }
 0x159   :  { %v618_v57 = vadd.f32 %v617_v40, %v1451_v49  ;;  %v633_v58 = vmul.f32 %v1451_v49, %v1451_v49  ;;  %v1461_v59 = vadd.f32 %v605_v56, %v552_v55  ;;  %v664_v55 = vld [vmem:[%s1503_s2] sm:$0x3] }
 0x15a   :  { %v637_v60 = vadd.f32 %v636_v42, %v632_v53  ;;  %v610_v61 = vadd.f32 %v609_v52, %v1456_v54  ;;  %v634_v62 = vmul.f32 %v1456_v54, %v1456_v54  ;;  %v1353_v42 = vmov 1966171168  }
 0x15b   :  { %v646_v63 = vadd.f32 %v645_v43, %v633_v58  ;;  %v619_v0 = vadd.f32 %v618_v57, %v1461_v59  ;;  %v635_v1 = vmul.f32 %v1461_v59, %v1461_v59  ;;  %v669_v43 = vunpack.c.l.s4 %v1353_v42 }
 0x15c   :  { %v611_v2 = vrot.slane %v610_v61, 4  ;;  %v638_v3 = vadd.f32 %v637_v60, %v634_v62  ;;  %v688_v57 = vsub.s32 0, %v672_v47  ;;  %v692_v58 = vsub.s32 1, %v672_v47 }
 0x15d   :  { %v620_v4 = vrot.slane %v619_v0, 4  ;;  %v647_v5 = vadd.f32 %v646_v63, %v635_v1  ;;  %v670_v45 = vunpack.c.0.s8 %v669_v43 }
 0x15e   :  { %v612_v6 = vadd.f32 %v611_v2, %v610_v61  ;;  %v639_v7 = vrot.slane %v638_v3, 4 }
 0x15f   :  { %v621_v8 = vadd.f32 %v620_v4, %v619_v0  ;;  %v648_v9 = vrot.slane %v647_v5, 4  ;;  %v673_v50 = vsub.s32 %v670_v45, %v672_v47 }
 0x160   :  { %v613_v10 = vrot.slane %v612_v6, 2  ;;  %v640_v11 = vadd.f32 %v639_v7, %v638_v3 }
 0x161   :  { %v622_v12 = vrot.slane %v621_v8, 2  ;;  %v649_v13 = vadd.f32 %v648_v9, %v647_v5 }
 0x162   :  { %v614_v14 = vadd.f32 %v613_v10, %v612_v6  ;;  %v641_v15 = vrot.slane %v640_v11, 2 }
 0x163   :  { %v623_v16 = vadd.f32 %v622_v12, %v621_v8  ;;  %v650_v17 = vrot.slane %v649_v13, 2 }
 0x164   :  { %v615_v18 = vrot.slane %v614_v14, 1  ;;  %v642_v19 = vadd.f32 %v641_v15, %v640_v11 }
 0x165   :  { %v624_v20 = vrot.slane %v623_v16, 1  ;;  %v651_v21 = vadd.f32 %v650_v17, %v649_v13 }
 0x166   :  { %v616_v22 = vadd.f32 %v615_v18, %v614_v14  ;;  %v643_v23 = vrot.slane %v642_v19, 1 }
 0x167   :  { %v625_v24 = vadd.f32 %v624_v20, %v623_v16  ;;  %v652_v25 = vrot.slane %v651_v21, 1 }
 0x168   :  { %v626_v27 = vmul.f32 0.03125, %v616_v22  ;;  %v644_v28 = vadd.f32 %v643_v23, %v642_v19 }
 0x169   :  { %v627_v30 = vmul.f32 0.03125, %v625_v24  ;;  %v653_v31 = vadd.f32 %v652_v25, %v651_v21 }
 0x16a   :  { %v654_v33 = vmul.f32 0.03125, %v644_v28  ;;  %v656_v34 = vmul.f32 %v626_v27, %v626_v27 }
 0x16b   :  { %v655_v36 = vmul.f32 0.03125, %v653_v31  ;;  %v657_v37 = vmul.f32 %v627_v30, %v627_v30 }
 0x16c   :  { %v658_v38 = vsub.f32 %v654_v33, %v656_v34  ;;  %v1042_v33 = vld [vmem:[%s1506_s5] ss:$0 sm:$0xff]  ;;  %s1316_s5 = scalar_lea.vmem %s958_s19, 512 }
 0x16d   :  { %v659_v39 = vsub.f32 %v655_v36, %v657_v37  ;;  %p1317_p10 = scmp.ne.s32.totalorder %s958_s19, %s1316_s5  ;;  %p1322_p12 = scmp.lt.s32.totalorder %s1316_s5, %s1316_s5 }
 0x16e   :  { %v660_v40 = vadd.f32 1e-05, %v658_v38 }
 0x16f   :  { %v661_v41 = vadd.f32 1e-05, %v659_v39  ;;  %p1323_p13 = por %p1322_p12, %p1321_p11 }
 0x170   :  { %1246 = vrsqrt.f32 %v660_v40 }
 0x171   :  { %1248 = vrsqrt.f32 %v661_v41  ;;  %p1324_p0 = pnand %p1323_p13, %p1317_p10 }
 0x17a   :  { %v1247_v48 = vpop.eup %1246 }
 0x17b   :  { %v1249_v51 = vpop.eup %1248 }
 0x17c   :  { %v667_v52 = vcombine.low %v1247_v48, %v1249_v51 }
 0x17e   :  { %v674_v53 = vrot.slane %v667_v52, %v673_v50 }
 0x180   :  { %v681_v56 = vrot.slane %v674_v53, %v673_v50 }
 0x182   :  { %v683_v60 = vmul.f32 %v681_v56, %v664_v55 }
 0x184   :  { %v689_v61 = vrot.slane %v683_v60, %v688_v57  ;;  %v693_v62 = vrot.slane %v683_v60, %v692_v58 }
 0x186   :  { %v696_v63 = vmul.f32 %v689_v61, %v626_v27  ;;  %v697_v0 = vmul.f32 %v693_v62, %v627_v30  ;;  %v724_v1 = vmul.f32 %v693_v62, %v1461_v59  ;;  %v718_v2 = vmul.f32 %v693_v62, %v1431_v29  ;;  %v684_v59 = vld [vmem:[%s1504_s3] sm:$0x3] }
 0x187   :  { %v720_v3 = vmul.f32 %v693_v62, %v1435_v35  ;;  %v722_v4 = vmul.f32 %v693_v62, %v1451_v49  ;;  %v717_v5 = vmul.f32 %v689_v61, %v1429_v26  ;;  %v719_v6 = vmul.f32 %v689_v61, %v1433_v32 }
 0x188   :  { %v700_v7 = vcombine.low %v696_v63, %v697_v0  ;;  %v721_v8 = vmul.f32 %v689_v61, %v1449_v46  ;;  %v723_v9 = vmul.f32 %v689_v61, %v1456_v54 }
 0x18a   :  { %v707_v10 = vrot.slane %v700_v7, %v673_v50 }
 0x18c   :  { %v714_v11 = vrot.slane %v707_v10, %v673_v50 }
 0x18e   :  { %v716_v29 = vsub.f32 %v684_v59, %v714_v11 }
 0x190   :  { %v729_v12 = vrot.slane %v716_v29, %v688_v57  ;;  %v733_v35 = vrot.slane %v716_v29, %v692_v58 }
 0x192   :  { %v737_v13 = vadd.f32 %v733_v35, %v718_v2  ;;  %v739_v49 = vadd.f32 %v733_v35, %v720_v3  ;;  %v741_v14 = vadd.f32 %v733_v35, %v722_v4  ;;  %v743_v26 = vadd.f32 %v733_v35, %v724_v1 }
 0x193   :  { %v736_v15 = vadd.f32 %v729_v12, %v717_v5  ;;  %v738_v32 = vadd.f32 %v729_v12, %v719_v6  ;;  %v740_v16 = vadd.f32 %v729_v12, %v721_v8  ;;  %v742_v17 = vadd.f32 %v729_v12, %v723_v9 }
 0x194   :  { %v745_v46 = vmax.f32 %v737_v13, 0.0  ;;  %v747_v18 = vmax.f32 %v739_v49, 0.0  ;;  %v749_v54 = vmax.f32 %v741_v14, 0.0  ;;  %v751_v19 = vmax.f32 %v743_v26, 0.0 }
 0x195   :  { %v744_v20 = vmax.f32 %v736_v15, 0.0  ;;  %v746_v21 = vmax.f32 %v738_v32, 0.0  ;;  %v748_v22 = vmax.f32 %v740_v16, 0.0  ;;  %v750_v23 = vmax.f32 %v742_v17, 0.0 }
 0x196   :  { %v753_v24 = vpack.c.bf16 %v747_v18, %v745_v46  ;;  %v755_v25 = vpack.c.bf16 %v751_v19, %v749_v54 }
 0x197   :  { %v752_v27 = vpack.c.bf16 %v746_v21, %v744_v20  ;;  %v754_v28 = vpack.c.bf16 %v750_v23, %v748_v22 }
 0x198   :  { %931 = vmatprep.mubr.bf16.mxu0 %v753_v24  ;;  %939 = vmatprep.mubr.bf16.mxu1 %v755_v25 }
 0x199   :  { %932 = vmatmul.mubr.bf16.vlgmr.msra.gmra.mrb[8].mxu0 %v752_v27  ;;  %940 = vmatmul.mubr.bf16.vlgmr.msra.gmra.mrb[8].mxu1 %v754_v28 }
 0x26c   :  { %v1075_v30 = vpop.f32.mrb[8].mxu0  ;;  %v1081_v31 = vpop.f32.mrb[8].mxu1 }
 0x26d   :  { %v1076_v34 = vpop.f32.mrb[9].mxu0  ;;  %v1082_v36 = vpop.f32.mrb[9].mxu1 }
 0x26e   :  { %v1077_v37 = vadd.f32 %v1076_v34, %v1075_v30  ;;  %v1083_v38 = vadd.f32 %v1082_v36, %v1081_v31  ;;  %v1078_v39 = vpop.f32.mrb[10].mxu0  ;;  %v1084_v40 = vpop.f32.mrb[10].mxu1 }
 0x26f   :  { %v1079_v41 = vpop.f32.mrb[11].mxu0  ;;  %v1085_v42 = vpop.f32.mrb[11].mxu1 }
 0x270   :  { %v934_v43 = vadd.f32 %v1077_v37, %v1042_v33  ;;  %v942_v44 = vadd.f32 %v1083_v38, %v1042_v33  ;;  %v1080_v45 = vadd.f32 %v1079_v41, %v1078_v39  ;;  %v1086_v47 = vadd.f32 %v1085_v42, %v1084_v40 }
 0x272   :  { %948 = vst [vmem:[#allocation9] sm:$0xff] %v934_v43  ;;  %950 = vst [vmem:[#allocation9 + $0x10] sm:$0xff] %v942_v44  ;;  %v937_v48 = vadd.f32 %v1080_v45, %v1042_v33  ;;  %v945_v50 = vadd.f32 %v1086_v47, %v1042_v33 }
 0x274   :  { %949 = vst [vmem:[#allocation9 + $0x8] sm:$0xff] %v937_v48  ;;  %951 = vst [vmem:[#allocation9 + $0x18] sm:$0xff] %v945_v50 }
 0x275   :  { %1327 = shalt.err (!%p1324_p0)
}
 0x276   :  { %s1328_s21 = scalar_lea.hbm %s1507_s6, 512 }
 0x277   :  { %p1329_p1 = scmp.ne.s32.totalorder %s1507_s6, %s1328_s21  ;;  %p1332_p2 = scmp.lt.u32.totalorder %s1328_s21, %s1507_s6 }
 0x279   :  { %p1334_p3 = pnand %p1332_p2, %p1329_p1 }
 0x27b   :  { %1337 = shalt.err (!%p1334_p3)
}
 0x27c   :  { %963 = dma.vmem_to_hbm [thread:$0]  %s958_s19, 512, %s1507_s6, [#allocation5], %s1345_s7, %s1345_s7, %s1346_s8  }
 0x27d   :  { %1342 = dma.done.wait [#allocation5], 512  }
 0x27e   :  { %1343 = vsyncadd [#allocation5], 4294966784 }
 0x27f   :  { %967 = vsyncpa [#allocation4], 1 }
 0x280   :  { %968 = vsyncpa [#allocation7], 1 }
 0x281   :  { %969 = vsyncpa [#allocation5], 1 }

</bundles_post_ra>
